<compile_context>
chip_gen: v7x
topology: tpu7x:2x2x1
jax: 0.10.0
libtpu: 0.0.40
codegen_flags: <defaults>
</compile_context>

<pallas_src>
import functools

import jax
import jax.numpy as jnp
from jax.experimental import pallas as pl
from jax.experimental.pallas import tpu as pltpu


def _round_down(x, m):
    return (x // m) * m


def _vmem_capacity_bytes():
    try:
        return int(pltpu.get_tpu_info().vmem_capacity_bytes)
    except Exception:
        return 64 << 20  # conservative per-core floor (v7x)


def build_perm_matrix(perm, d_model, dtype):
    """One-hot permutation matrix: P[i, j] = 1 iff i == perm[j].

    Build once at module init (perm is a fixed buffer) and reuse across calls.
    x @ P == x[:, perm]; x @ P.T == x[:, argsort(perm)] (the inverse pass).
    """
    perm = jnp.asarray(perm, dtype=jnp.int32)
    row_ids = jax.lax.broadcasted_iota(jnp.int32, (d_model, d_model), 0)
    return (row_ids == perm[None, :]).astype(dtype)


def _permute_kernel(x_ref, p_ref, o_ref, *, precision):
    """o = x @ p on the MXU.  x:(tb, D), p:(D, tn), o:(tb, tn)."""
    o_ref[...] = jnp.dot(
        x_ref[...],
        p_ref[...],
        preferred_element_type=jnp.float32,
        precision=precision,
    ).astype(o_ref.dtype)


def _pick_batch_tile(B, rows_budget):
    """Largest legal batch tile <= min(B, 1024, rows_budget)."""
    if B <= rows_budget and B <= 1024:
        return B  # single block; block dim == array dim is always legal
    tb = max(8, min(1024, rows_budget))
    if tb >= 256:
        tb = _round_down(tb, 256)  # MXU-friendly multiple
    else:
        tb = max(8, _round_down(tb, 8))
    return tb


def rand_perm_forward(x, P):
    """Pallas equivalent of RandPerm.forward: returns (x[:, perm], 0).

    P must be build_perm_matrix(perm, d_model, x.dtype); cache it across calls.
    """
    B, D = x.shape
    dtype = x.dtype
    assert P.shape == (D, D) and P.dtype == dtype, "P must be (D, D) in x.dtype"

    itemsize = jnp.dtype(dtype).itemsize
    # 0/1 P + HIGHEST precision => bit-exact gather for f32; bf16 runs native.
    precision = (jax.lax.Precision.HIGHEST
                 if dtype == jnp.float32 else jax.lax.Precision.DEFAULT)
    kernel = functools.partial(_permute_kernel, precision=precision)

    # Generation-aware VMEM budget, leaving headroom for compiler scratch.
    vmem_cap = _vmem_capacity_bytes()
    budget = (vmem_cap * 3) // 4

    # Budget P conservatively as if double-buffered (we request single-buffer).
    p_resident_bytes = 2 * D * D * itemsize
    per_row_resident = 4 * D * itemsize  # double-buffered x-tile row + out-tile row

    if p_resident_bytes + 8 * per_row_resident <= budget:
        # ---- Path 1: P fully VMEM-resident, 1-D grid over batch tiles. ----
        tb = _pick_batch_tile(B, (budget - p_resident_bytes) // per_row_resident)
        grid = (pl.cdiv(B, tb),)
        req = D * D * itemsize + 4 * tb * D * itemsize
        vmem_limit = int(min(vmem_cap, max(req + (4 << 20), 32 << 20)))

        def _resident_call(p_spec):
            return pl.pallas_call(
                kernel,
                out_shape=jax.ShapeDtypeStruct((B, D), dtype),
                grid_spec=pltpu.PrefetchScalarGridSpec(
                    num_scalar_prefetch=0,
                    grid=grid,
                    in_specs=[
                        pl.BlockSpec((tb, D), lambda i: (i, 0)),  # x batch tile
                        p_spec,                                   # resident P
                    ],
                    out_specs=pl.BlockSpec((tb, D), lambda i: (i, 0)),
                ),
                compiler_params=pltpu.CompilerParams(
                    dimension_semantics=("parallel",),  # batch sharded across TCs
                    vmem_limit_bytes=vmem_limit,
                ),
            )(x, P)

        try:
            # P's block index never changes -> single-buffer it (halves its VMEM,
            # DMA'd from HBM exactly once for the whole call).
            y = _resident_call(
                pl.BlockSpec((D, D), lambda i: (0, 0),
                             pipeline_mode=pl.Buffered(1)))
        except Exception:
            # Fallback for jax builds without BlockSpec pipeline_mode support.
            y = _resident_call(pl.BlockSpec((D, D), lambda i: (0, 0)))
    else:
        # ---- Path 2: very large D — column-block P, batch as inner axis so ----
        # each P column slab is loaded once and reused over the whole batch.
        tn = 512
        while tn > 128 and 2 * D * tn * itemsize > budget // 2:
            tn //= 2  # stays a multiple of 128: 512 -> 256 -> 128
        p_slab_bytes = 2 * D * tn * itemsize
        per_row = 2 * (D + tn) * itemsize
        rows_budget = max(8, (budget - p_slab_bytes) // per_row)
        tb = _pick_batch_tile(B, rows_budget)
        # TODO(synk): K-block the contraction with an f32 accumulator scratch
        # when even a (D, 128) P slab + 8-row x tile exceed the VMEM budget.
        grid = (pl.cdiv(D, tn), pl.cdiv(B, tb))
        req = p_slab_bytes + 2 * tb * (D + tn) * itemsize
        vmem_limit = int(min(vmem_cap, max(req + (4 << 20), 32 << 20)))
        y = pl.pallas_call(
            kernel,
            out_shape=jax.ShapeDtypeStruct((B, D), dtype),
            grid_spec=pltpu.PrefetchScalarGridSpec(
                num_scalar_prefetch=0,
                grid=grid,
                in_specs=[
                    pl.BlockSpec((tb, D), lambda j, i: (i, 0)),   # x batch tile
                    pl.BlockSpec((D, tn), lambda j, i: (0, j)),   # P column slab
                ],
                out_specs=pl.BlockSpec((tb, tn), lambda j, i: (i, j)),
            ),
            compiler_params=pltpu.CompilerParams(
                # Shard only the batch axis across TensorCores; column axis is
                # the slow outer loop so P slabs are not re-streamed per core.
                dimension_semantics=("arbitrary", "parallel"),
                vmem_limit_bytes=vmem_limit,
            ),
        )(x, P)

    return y, jnp.zeros((), dtype=dtype)


if __name__ == "__main__":
    key = jax.random.PRNGKey(0)
    B, D = 16, 32  # batch, d_model (small shapes consistent with the module)

    kx, kp = jax.random.split(key)
    x = jax.random.normal(kx, (B, D), dtype=jnp.float32)
    # Deterministic permutation (plays the role of the torch.randperm buffer).
    perm = jax.random.permutation(kp, D).astype(jnp.int32)

    # Module-init analog: build the one-hot matrix ONCE and reuse per forward.
    P = build_perm_matrix(perm, D, x.dtype)

    y, logdet = rand_perm_forward(x, P)
    y = jax.block_until_ready(y)

    # Reference check: x[:, perm]
    ref = x[:, perm]
    assert y.shape == ref.shape and y.dtype == ref.dtype
    assert jnp.array_equal(y, ref), "mismatch vs reference gather"
    assert float(logdet) == 0.0

    print("KERNEL_OK")
</pallas_src>

<mosaic_0001>
module attributes {stable_mosaic.version = 11 : i64} {
  func.func @_permute_kernel(%arg0: i32, %arg1: memref<16x32xf32, #tpu.memory_space<vmem>>, %arg2: memref<32x32xf32, #tpu.memory_space<vmem>>, %arg3: memref<16x32xf32, #tpu.memory_space<vmem>>) attributes {dimension_semantics = [#tpu.dimension_semantics<parallel>], iteration_bounds = array<i64: 1>, scalar_prefetch = 0 : i64, scratch_operands = 0 : i64, tpu.core_type = #tpu.core_type<tc>, window_params = [{transform_indices = @transform_0, window_bounds = array<i64: 16, 32>}, {pipeline_mode = #tpu.pipeline_mode<synchronous>, transform_indices = @transform_1, window_bounds = array<i64: 32, 32>}, {transform_indices = @transform_2, window_bounds = array<i64: 16, 32>}]} {
    %c0 = arith.constant 0 : index
    %c0_0 = arith.constant 0 : index
    %0 = vector.load %arg1[%c0, %c0_0] : memref<16x32xf32, #tpu.memory_space<vmem>>, vector<16x32xf32>
    %c0_1 = arith.constant 0 : index
    %c0_2 = arith.constant 0 : index
    %1 = vector.load %arg2[%c0_1, %c0_2] : memref<32x32xf32, #tpu.memory_space<vmem>>, vector<32x32xf32>
    %cst = arith.constant dense<0.000000e+00> : vector<16x32xf32>
    %2 = tpu.matmul %0, %1, %cst {dimension_numbers = #tpu.dot_dimension_numbers<[1], [0], [0], [1], [0, 0, 1, 1], [], []>, precision = #tpu.contract_precision<fp32>} : vector<16x32xf32>, vector<32x32xf32>, vector<16x32xf32> -> vector<16x32xf32>
    %c0_3 = arith.constant 0 : index
    %c0_4 = arith.constant 0 : index
    %3 = vector.load %arg3[%c0_3, %c0_4] : memref<16x32xf32, #tpu.memory_space<vmem>>, vector<16x32xf32>
    tpu.vector_store %arg3[%c0_3, %c0_4], %2 {strides = array<i32>} : memref<16x32xf32, #tpu.memory_space<vmem>>, vector<16x32xf32>,
    return
  }
  func.func @transform_0(%arg0: i32) -> (i32, i32) {
    %c0_i32 = arith.constant 0 : i32
    %c0_i32_0 = arith.constant 0 : i32
    return %arg0, %c0_i32 : i32, i32
  }
  func.func @transform_1(%arg0: i32) -> (i32, i32) {
    %c0_i32 = arith.constant 0 : i32
    %c0_i32_0 = arith.constant 0 : i32
    %c0_i32_1 = arith.constant 0 : i32
    return %c0_i32, %c0_i32_0 : i32, i32
  }
  func.func @transform_2(%arg0: i32) -> (i32, i32) {
    %c0_i32 = arith.constant 0 : i32
    %c0_i32_0 = arith.constant 0 : i32
    return %arg0, %c0_i32 : i32, i32
  }
}

module attributes {stable_mosaic.version = 11 : i64} {
  func.func @_permute_kernel(%arg0: i32, %arg1: memref<16x32xf32, #tpu.memory_space<vmem>>, %arg2: memref<32x32xf32, #tpu.memory_space<vmem>>, %arg3: memref<16x32xf32, #tpu.memory_space<vmem>>) attributes {dimension_semantics = [#tpu.dimension_semantics<parallel>], iteration_bounds = array<i64: 1>, scalar_prefetch = 0 : i64, scratch_operands = 0 : i64, tpu.core_type = #tpu.core_type<tc>, window_params = [{transform_indices = @transform_0, window_bounds = array<i64: 16, 32>}, {pipeline_mode = #tpu.pipeline_mode<synchronous>, transform_indices = @transform_1, window_bounds = array<i64: 32, 32>}, {transform_indices = @transform_2, window_bounds = array<i64: 16, 32>}]} {
    %c0 = arith.constant 0 : index
    %c0_0 = arith.constant 0 : index
    %0 = vector.load %arg1[%c0, %c0_0] : memref<16x32xf32, #tpu.memory_space<vmem>>, vector<16x32xf32>
    %c0_1 = arith.constant 0 : index
    %c0_2 = arith.constant 0 : index
    %1 = vector.load %arg2[%c0_1, %c0_2] : memref<32x32xf32, #tpu.memory_space<vmem>>, vector<32x32xf32>
    %cst = arith.constant dense<0.000000e+00> : vector<16x32xf32>
    %2 = tpu.matmul %0, %1, %cst {dimension_numbers = #tpu.dot_dimension_numbers<[1], [0], [0], [1], [0, 0, 1, 1], [], []>, precision = #tpu.contract_precision<fp32>} : vector<16x32xf32>, vector<32x32xf32>, vector<16x32xf32> -> vector<16x32xf32>
    %c0_3 = arith.constant 0 : index
    %c0_4 = arith.constant 0 : index
    %3 = vector.load %arg3[%c0_3, %c0_4] : memref<16x32xf32, #tpu.memory_space<vmem>>, vector<16x32xf32>
    tpu.vector_store %arg3[%c0_3, %c0_4], %2 {strides = array<i32>} : memref<16x32xf32, #tpu.memory_space<vmem>>, vector<16x32xf32>,
    return
  }
  func.func @transform_0(%arg0: i32) -> (i32, i32) {
    %c0_i32 = arith.constant 0 : i32
    %c0_i32_0 = arith.constant 0 : i32
    return %arg0, %c0_i32 : i32, i32
  }
  func.func @transform_1(%arg0: i32) -> (i32, i32) {
    %c0_i32 = arith.constant 0 : i32
    %c0_i32_0 = arith.constant 0 : i32
    %c0_i32_1 = arith.constant 0 : i32
    return %c0_i32, %c0_i32_0 : i32, i32
  }
  func.func @transform_2(%arg0: i32) -> (i32, i32) {
    %c0_i32 = arith.constant 0 : i32
    %c0_i32_0 = arith.constant 0 : i32
    return %arg0, %c0_i32 : i32, i32
  }
}

</mosaic_0001>

<bundles_post_ra>
// kernel: tpu_custom_call.1
= control target key start
LH: loop header
LB: loop body
LE: loop exit
PB: predicated region body
PF: predicated region fallthrough
CT: control target
= control target key end

     0   :  { %7 = vsyncpa [#allocation3], 0  ;;  %s919_s0 = inlined_call_operand.hbm [shape: f32[16,32], index: 0, kind: input, shape index: {}]   ;;  %s920_s1 = inlined_call_operand.hbm [shape: f32[32,32], index: 1, kind: input, shape index: {}]   ;;  %s921_s2 = inlined_call_operand.hbm [shape: f32[16,32], index: 2, kind: output, shape index: {}]  }
   0x1   :  { %8 = vsyncpa [#allocation6], 0 }
   0x2   :  { %9 = vsyncpa [#allocation4], 0  ;;  %s838_s9 = smov [#allocation2]   ;;  %s766_s13 = scalar_lea.hbm %s919_s0, 256 }
   0x3   :  { %s15_s10 = sshll.u32 %s838_s9, 4  ;;  %p767_p0 = scmp.ne.s32.totalorder %s919_s0, %s766_s13  ;;  %s16_s10 = int_to_ptr.vmem [resolvable:$true] %s15_s10 }
   0x4   :  { %p770_p1 = scmp.lt.u32.totalorder %s766_s13, %s919_s0 }
   0x6   :  { %p772_p2 = pnand %p770_p1, %p767_p0 }
   0x8   :  { %775 = shalt.err (!%p772_p2)
}
   0x9   :  { %s776_s18 = scalar_lea.vmem %s16_s10, 256  ;;  %p781_p4 = scmp.lt.s32.totalorder %s16_s10, %s16_s10 }
   0xa   :  { %p777_p3 = scmp.ne.s32.totalorder %s16_s10, %s776_s18  ;;  %p782_p5 = scmp.lt.s32.totalorder %s776_s18, %s776_s18 }
   0xc   :  { %p783_p6 = por %p782_p5, %p781_p4 }
   0xe   :  { %p784_p7 = pnand %p783_p6, %p777_p3 }
  0x10   :  { %787 = shalt.err (!%p784_p7)
}
  0x11   :  { %s839_s19 = smov 128   ;;  %s840_s20 = smov 8  }
  0x12   :  { %21 = dma.hbm_to_vmem [thread:$0]  %s919_s0, 256, %s16_s10, [#allocation3], %s839_s19, %s839_s19, %s840_s20  }
  0x13   :  { %s841_s23 = smov [#allocation5]   ;;  %s788_s27 = scalar_lea.hbm %s920_s1, 512 }
  0x14   :  { %s27_s24 = sshll.u32 %s841_s23, 4  ;;  %p789_p8 = scmp.ne.s32.totalorder %s920_s1, %s788_s27  ;;  %s28_s24 = int_to_ptr.vmem [resolvable:$true] %s27_s24 }
  0x15   :  { %p792_p9 = scmp.lt.u32.totalorder %s788_s27, %s920_s1 }
  0x17   :  { %p794_p10 = pnand %p792_p9, %p789_p8 }
  0x19   :  { %797 = shalt.err (!%p794_p10)
}
  0x1a   :  { %s798_s4 = scalar_lea.vmem %s28_s24, 512  ;;  %p803_p12 = scmp.lt.s32.totalorder %s28_s24, %s28_s24 }
  0x1b   :  { %p799_p11 = scmp.ne.s32.totalorder %s28_s24, %s798_s4  ;;  %p804_p13 = scmp.lt.s32.totalorder %s798_s4, %s798_s4 }
  0x1d   :  { %p805_p0 = por %p804_p13, %p803_p12 }
  0x1f   :  { %p806_p1 = pnand %p805_p0, %p799_p11 }
  0x21   :  { %809 = shalt.err (!%p806_p1)
}
  0x22   :  { %33 = dma.hbm_to_vmem [thread:$0]  %s920_s1, 512, %s28_s24, [#allocation6], %s839_s19, %s839_s19, %s840_s20  }
  0x23   :  { %832 = dma.done.wait [#allocation3], 256  }
  0x24   :  { %833 = vsyncadd [#allocation3], 4294967040 }
  0x25   :  { %834 = dma.done.wait [#allocation6], 512  }
  0x26   :  { %835 = vsyncadd [#allocation6], 4294966784  ;;  %vm46_vm0 = vcmask 261120   ;;  %v42_v0 = vld [vmem:[#allocation5] sm:$0xff]  ;;  %v43_v1 = vld [vmem:[#allocation5 + $0x8] sm:$0xff]  ;;  %s842_s1 = smov [#allocation7]  }
  0x27   :  { %v44_v2 = vld [vmem:[#allocation5 + $0x10] sm:$0xff]  ;;  %v54_v3 = vand.u32 4294901760, %v42_v0  ;;  %v57_v4 = vand.u32 4294901760, %v43_v1  ;;  %v45_v5 = vld [vmem:[#allocation5 + $0x18] sm:$0xff]  ;;  %s588_s6 = sshll.u32 %s842_s1, 4  ;;  %s589_s6 = int_to_ptr.vmem [resolvable:$true] %s588_s6 }
  0x28   :  { %v60_v6 = vand.u32 4294901760, %v44_v2  ;;  %v40_v7 = vld [vmem:[#allocation2] sm:$0xff]  ;;  %v41_v8 = vld [vmem:[#allocation2 + $0x8] sm:$0xff]  ;;  %v63_v9 = vand.u32 4294901760, %v45_v5  ;;  %s810_s7 = scalar_lea.vmem %s589_s6, 256  ;;  %p815_p3 = scmp.lt.s32.totalorder %s589_s6, %s589_s6 }
  0x29   :  { %v48_v10 = vsel %vm46_vm0, %v40_v7, 0  ;;  %v51_v11 = vsel %vm46_vm0, %v41_v8, 0  ;;  %v703_v12 = vpack.c.bf16 %v57_v4, %v54_v3  ;;  %v144_v15 = vsub.f32 %v42_v0, %v54_v3  ;;  %p811_p2 = scmp.ne.s32.totalorder %s589_s6, %s810_s7  ;;  %p816_p4 = scmp.lt.s32.totalorder %s810_s7, %s810_s7 }
  0x2a   :  { %v890_v13 = vand.u32 4294901760, %v48_v10  ;;  %v892_v14 = vand.u32 4294901760, %v51_v11  ;;  %v707_v16 = vpack.c.bf16 %v63_v9, %v60_v6  ;;  %v151_v17 = vsub.f32 %v43_v1, %v57_v4 }
  0x2b   :  { %v158_v18 = vsub.f32 %v44_v2, %v60_v6  ;;  %v165_v19 = vsub.f32 %v45_v5, %v63_v9  ;;  %704 = vmatprep.subr.bf16.mxu1 %v703_v12  ;;  %728 = vmatprep.subr.bf16.mxu0 %v703_v12  ;;  %v145_v22 = vand.u32 4294901760, %v144_v15  ;;  %p817_p5 = por %p816_p4, %p815_p3 }
  0x2c   :  { %v123_v20 = vsub.f32 %v48_v10, %v890_v13  ;;  %v133_v21 = vsub.f32 %v51_v11, %v892_v14  ;;  %706 = vmatpush3.bf16.msra.mxu1 %v703_v12  ;;  %730 = vmatpush3.bf16.msra.mxu0 %v703_v12  ;;  %v152_v23 = vand.u32 4294901760, %v151_v17  ;;  %v719_v44 = vpack.c.bf16 %v151_v17, %v144_v15 }
  0x2d   :  { %v159_v24 = vand.u32 4294901760, %v158_v18  ;;  %v166_v25 = vand.u32 4294901760, %v165_v19  ;;  %708 = vmatprep.subr.bf16.mxu1 %v707_v16  ;;  %732 = vmatprep.subr.bf16.mxu0 %v707_v16  ;;  %v146_v28 = vsub.f32 %v144_v15, %v145_v22  ;;  %v723_v45 = vpack.c.bf16 %v165_v19, %v158_v18  ;;  %p818_p6 = pnand %p817_p5, %p811_p2 }
  0x2e   :  { %v124_v26 = vand.u32 4294901760, %v123_v20  ;;  %v134_v27 = vand.u32 4294901760, %v133_v21  ;;  %v153_v29 = vsub.f32 %v151_v17, %v152_v23  ;;  %v735_v30 = vpack.c.bf16 %v152_v23, %v145_v22 }
  0x2f   :  { %v160_v31 = vsub.f32 %v158_v18, %v159_v24  ;;  %v167_v32 = vsub.f32 %v165_v19, %v166_v25  ;;  %v147_v35 = vand.u32 4294901760, %v146_v28  ;;  %v739_v43 = vpack.c.bf16 %v166_v25, %v159_v24 }
  0x30   :  { %v125_v33 = vsub.f32 %v123_v20, %v124_v26  ;;  %678 = vmatprep.mubr.f32.mxu0 %v124_v26  ;;  %v135_v34 = vsub.f32 %v133_v21, %v134_v27  ;;  %710 = vmatpush3.bf16.msra.mxu1 %v707_v16  ;;  %v154_v36 = vand.u32 4294901760, %v153_v29 }
  0x31   :  { %734 = vmatpush3.bf16.msra.mxu0 %v707_v16  ;;  %v161_v37 = vand.u32 4294901760, %v160_v31  ;;  %v168_v38 = vand.u32 4294901760, %v167_v32 }
  0x32   :  { %v126_v39 = vand.u32 4294901760, %v125_v33  ;;  %v136_v40 = vand.u32 4294901760, %v135_v34  ;;  %736 = vmatprep.subr.bf16.mxu0 %v735_v30  ;;  %v711_v41 = vpack.c.bf16 %v154_v36, %v147_v35 }
  0x33   :  { %v715_v42 = vpack.c.bf16 %v168_v38, %v161_v37 }
  0x34   :  { %645 = vmatprep.mubr.f32.mxu1 %v126_v39  ;;  %679 = vmatmul.mubr.f32.vlgmr.msra.gmra.mrb[0].mxu0 %v134_v27 }
  0x35   :  { %646 = vmatmul.mubr.f32.vlgmr.msra.gmra.mrb[0].mxu1 %v136_v40  ;;  %712 = vmatprep.subr.bf16.mxu1 %v711_v41 }
  0x36   :  { %714 = vmatpush3.bf16.msra.mxu1 %v711_v41  ;;  %738 = vmatpush3.bf16.msra.mxu0 %v735_v30 }
  0x37   :  { %716 = vmatprep.subr.bf16.mxu1 %v715_v42  ;;  %740 = vmatprep.subr.bf16.mxu0 %v739_v43 }
  0x38   :  { %656 = vmatprep.mubr.f32.mxu1 %v890_v13  ;;  %689 = vmatprep.mubr.f32.mxu0 %v890_v13 }
  0x3a   :  { %718 = vmatpush3.bf16.msra.mxu1 %v715_v42  ;;  %742 = vmatpush3.bf16.msra.mxu0 %v739_v43 }
  0x3b   :  { %720 = vmatprep.subr.bf16.mxu1 %v719_v44  ;;  %744 = vmatprep.subr.bf16.mxu0 %v703_v12 }
  0x3d   :  { %657 = vmatmul.mubr.f32.vlgmr.msra.gmra.mrb[0].mxu1 %v892_v14  ;;  %690 = vmatmul.mubr.f32.vlgmr.msra.gmra.mrb[0].mxu0 %v892_v14 }
  0x3e   :  { %722 = vmatpush3.bf16.msra.mxu1 %v719_v44  ;;  %746 = vmatpush3.bf16.msra.mxu0 %v703_v12 }
  0x3f   :  { %724 = vmatprep.subr.bf16.mxu1 %v723_v45  ;;  %748 = vmatprep.subr.bf16.mxu0 %v707_v16 }
  0x40   :  { %667 = vmatprep.mubr.f32.mxu1 %v123_v20  ;;  %700 = vmatprep.mubr.f32.mxu0 %v890_v13 }
  0x42   :  { %726 = vmatpush3.bf16.msra.mxu1 %v723_v45  ;;  %750 = vmatpush3.bf16.msra.mxu0 %v707_v16 }
  0x45   :  { %668 = vmatmul.mubr.f32.vlgmr.msra.gmra.mrb[0].mxu1 %v133_v21  ;;  %701 = vmatmul.mubr.f32.vlgmr.msra.gmra.mrb[0].mxu0 %v892_v14 }
 0x118   :  { %v669_v46 = vpop.f32.mrb[0].mxu1  ;;  %v702_v47 = vpop.f32.mrb[0].mxu0 }
 0x119   :  { %v751_v48 = vadd.f32 %v702_v47, %v669_v46  ;;  %v315_v49 = vpop.f32.mrb[1].mxu1  ;;  %v571_v50 = vpop.f32.mrb[1].mxu0 }
 0x11a   :  { %v752_v51 = vadd.f32 %v571_v50, %v315_v49 }
 0x11b   :  { %582 = vst.msk [vmem:[#allocation7 + $0x8] sm:$0xff] %vm46_vm0, %v751_v48 }
 0x11c   :  { %581 = vst.msk [vmem:[#allocation7] sm:$0xff] %vm46_vm0, %v752_v51 }
 0x11d   :  { %821 = shalt.err (!%p818_p6)
}
 0x11e   :  { %s822_s10 = scalar_lea.hbm %s921_s2, 256 }
 0x11f   :  { %p823_p7 = scmp.ne.s32.totalorder %s921_s2, %s822_s10  ;;  %p826_p8 = scmp.lt.u32.totalorder %s822_s10, %s921_s2 }
 0x121   :  { %p828_p9 = pnand %p826_p8, %p823_p7 }
 0x123   :  { %831 = shalt.err (!%p828_p9)
}
 0x124   :  { %594 = dma.vmem_to_hbm [thread:$0]  %s589_s6, 256, %s921_s2, [#allocation4], %s839_s19, %s839_s19, %s840_s20  }
 0x125   :  { %836 = dma.done.wait [#allocation4], 256  }
 0x126   :  { %837 = vsyncadd [#allocation4], 4294967040 }
 0x127   :  { %598 = vsyncpa [#allocation3], 1 }
 0x128   :  { %599 = vsyncpa [#allocation6], 1 }
 0x129   :  { %600 = vsyncpa [#allocation4], 1 }

// kernel: tpu_custom_call.1
= control target key start
LH: loop header
LB: loop body
LE: loop exit
PB: predicated region body
PF: predicated region fallthrough
CT: control target
= control target key end

     0   :  { %7 = vsyncpa [#allocation3], 0  ;;  %s919_s0 = inlined_call_operand.hbm [shape: f32[16,32], index: 0, kind: input, shape index: {}]   ;;  %s920_s1 = inlined_call_operand.hbm [shape: f32[32,32], index: 1, kind: input, shape index: {}]   ;;  %s921_s2 = inlined_call_operand.hbm [shape: f32[16,32], index: 2, kind: output, shape index: {}]  }
   0x1   :  { %8 = vsyncpa [#allocation6], 0 }
   0x2   :  { %9 = vsyncpa [#allocation4], 0  ;;  %s838_s9 = smov [#allocation2]   ;;  %s766_s13 = scalar_lea.hbm %s919_s0, 256 }
   0x3   :  { %s15_s10 = sshll.u32 %s838_s9, 4  ;;  %p767_p0 = scmp.ne.s32.totalorder %s919_s0, %s766_s13  ;;  %s16_s10 = int_to_ptr.vmem [resolvable:$true] %s15_s10 }
   0x4   :  { %p770_p1 = scmp.lt.u32.totalorder %s766_s13, %s919_s0 }
   0x6   :  { %p772_p2 = pnand %p770_p1, %p767_p0 }
   0x8   :  { %775 = shalt.err (!%p772_p2)
}
   0x9   :  { %s776_s18 = scalar_lea.vmem %s16_s10, 256  ;;  %p781_p4 = scmp.lt.s32.totalorder %s16_s10, %s16_s10 }
   0xa   :  { %p777_p3 = scmp.ne.s32.totalorder %s16_s10, %s776_s18  ;;  %p782_p5 = scmp.lt.s32.totalorder %s776_s18, %s776_s18 }
   0xc   :  { %p783_p6 = por %p782_p5, %p781_p4 }
   0xe   :  { %p784_p7 = pnand %p783_p6, %p777_p3 }
  0x10   :  { %787 = shalt.err (!%p784_p7)
}
  0x11   :  { %s839_s19 = smov 128   ;;  %s840_s20 = smov 8  }
  0x12   :  { %21 = dma.hbm_to_vmem [thread:$0]  %s919_s0, 256, %s16_s10, [#allocation3], %s839_s19, %s839_s19, %s840_s20  }
  0x13   :  { %s841_s23 = smov [#allocation5]   ;;  %s788_s27 = scalar_lea.hbm %s920_s1, 512 }
  0x14   :  { %s27_s24 = sshll.u32 %s841_s23, 4  ;;  %p789_p8 = scmp.ne.s32.totalorder %s920_s1, %s788_s27  ;;  %s28_s24 = int_to_ptr.vmem [resolvable:$true] %s27_s24 }
  0x15   :  { %p792_p9 = scmp.lt.u32.totalorder %s788_s27, %s920_s1 }
  0x17   :  { %p794_p10 = pnand %p792_p9, %p789_p8 }
  0x19   :  { %797 = shalt.err (!%p794_p10)
}
  0x1a   :  { %s798_s4 = scalar_lea.vmem %s28_s24, 512  ;;  %p803_p12 = scmp.lt.s32.totalorder %s28_s24, %s28_s24 }
  0x1b   :  { %p799_p11 = scmp.ne.s32.totalorder %s28_s24, %s798_s4  ;;  %p804_p13 = scmp.lt.s32.totalorder %s798_s4, %s798_s4 }
  0x1d   :  { %p805_p0 = por %p804_p13, %p803_p12 }
  0x1f   :  { %p806_p1 = pnand %p805_p0, %p799_p11 }
  0x21   :  { %809 = shalt.err (!%p806_p1)
}
  0x22   :  { %33 = dma.hbm_to_vmem [thread:$0]  %s920_s1, 512, %s28_s24, [#allocation6], %s839_s19, %s839_s19, %s840_s20  }
  0x23   :  { %832 = dma.done.wait [#allocation3], 256  }
  0x24   :  { %833 = vsyncadd [#allocation3], 4294967040 }
  0x25   :  { %834 = dma.done.wait [#allocation6], 512  }
  0x26   :  { %835 = vsyncadd [#allocation6], 4294966784  ;;  %vm46_vm0 = vcmask 261120   ;;  %v42_v0 = vld [vmem:[#allocation5] sm:$0xff]  ;;  %v43_v1 = vld [vmem:[#allocation5 + $0x8] sm:$0xff]  ;;  %s842_s1 = smov [#allocation7]  }
  0x27   :  { %v44_v2 = vld [vmem:[#allocation5 + $0x10] sm:$0xff]  ;;  %v54_v3 = vand.u32 4294901760, %v42_v0  ;;  %v57_v4 = vand.u32 4294901760, %v43_v1  ;;  %v45_v5 = vld [vmem:[#allocation5 + $0x18] sm:$0xff]  ;;  %s588_s6 = sshll.u32 %s842_s1, 4  ;;  %s589_s6 = int_to_ptr.vmem [resolvable:$true] %s588_s6 }
  0x28   :  { %v60_v6 = vand.u32 4294901760, %v44_v2  ;;  %v40_v7 = vld [vmem:[#allocation2] sm:$0xff]  ;;  %v41_v8 = vld [vmem:[#allocation2 + $0x8] sm:$0xff]  ;;  %v63_v9 = vand.u32 4294901760, %v45_v5  ;;  %s810_s7 = scalar_lea.vmem %s589_s6, 256  ;;  %p815_p3 = scmp.lt.s32.totalorder %s589_s6, %s589_s6 }
  0x29   :  { %v48_v10 = vsel %vm46_vm0, %v40_v7, 0  ;;  %v51_v11 = vsel %vm46_vm0, %v41_v8, 0  ;;  %v703_v12 = vpack.c.bf16 %v57_v4, %v54_v3  ;;  %v144_v15 = vsub.f32 %v42_v0, %v54_v3  ;;  %p811_p2 = scmp.ne.s32.totalorder %s589_s6, %s810_s7  ;;  %p816_p4 = scmp.lt.s32.totalorder %s810_s7, %s810_s7 }
  0x2a   :  { %v890_v13 = vand.u32 4294901760, %v48_v10  ;;  %v892_v14 = vand.u32 4294901760, %v51_v11  ;;  %v707_v16 = vpack.c.bf16 %v63_v9, %v60_v6  ;;  %v151_v17 = vsub.f32 %v43_v1, %v57_v4 }
  0x2b   :  { %v158_v18 = vsub.f32 %v44_v2, %v60_v6  ;;  %v165_v19 = vsub.f32 %v45_v5, %v63_v9  ;;  %704 = vmatprep.subr.bf16.mxu1 %v703_v12  ;;  %728 = vmatprep.subr.bf16.mxu0 %v703_v12  ;;  %v145_v22 = vand.u32 4294901760, %v144_v15  ;;  %p817_p5 = por %p816_p4, %p815_p3 }
  0x2c   :  { %v123_v20 = vsub.f32 %v48_v10, %v890_v13  ;;  %v133_v21 = vsub.f32 %v51_v11, %v892_v14  ;;  %706 = vmatpush3.bf16.msra.mxu1 %v703_v12  ;;  %730 = vmatpush3.bf16.msra.mxu0 %v703_v12  ;;  %v152_v23 = vand.u32 4294901760, %v151_v17  ;;  %v719_v44 = vpack.c.bf16 %v151_v17, %v144_v15 }
  0x2d   :  { %v159_v24 = vand.u32 4294901760, %v158_v18  ;;  %v166_v25 = vand.u32 4294901760, %v165_v19  ;;  %708 = vmatprep.subr.bf16.mxu1 %v707_v16  ;;  %732 = vmatprep.subr.bf16.mxu0 %v707_v16  ;;  %v146_v28 = vsub.f32 %v144_v15, %v145_v22  ;;  %v723_v45 = vpack.c.bf16 %v165_v19, %v158_v18  ;;  %p818_p6 = pnand %p817_p5, %p811_p2 }
  0x2e   :  { %v124_v26 = vand.u32 4294901760, %v123_v20  ;;  %v134_v27 = vand.u32 4294901760, %v133_v21  ;;  %v153_v29 = vsub.f32 %v151_v17, %v152_v23  ;;  %v735_v30 = vpack.c.bf16 %v152_v23, %v145_v22 }
  0x2f   :  { %v160_v31 = vsub.f32 %v158_v18, %v159_v24  ;;  %v167_v32 = vsub.f32 %v165_v19, %v166_v25  ;;  %v147_v35 = vand.u32 4294901760, %v146_v28  ;;  %v739_v43 = vpack.c.bf16 %v166_v25, %v159_v24 }
  0x30   :  { %v125_v33 = vsub.f32 %v123_v20, %v124_v26  ;;  %678 = vmatprep.mubr.f32.mxu0 %v124_v26  ;;  %v135_v34 = vsub.f32 %v133_v21, %v134_v27  ;;  %710 = vmatpush3.bf16.msra.mxu1 %v707_v16  ;;  %v154_v36 = vand.u32 4294901760, %v153_v29 }
  0x31   :  { %734 = vmatpush3.bf16.msra.mxu0 %v707_v16  ;;  %v161_v37 = vand.u32 4294901760, %v160_v31  ;;  %v168_v38 = vand.u32 4294901760, %v167_v32 }
  0x32   :  { %v126_v39 = vand.u32 4294901760, %v125_v33  ;;  %v136_v40 = vand.u32 4294901760, %v135_v34  ;;  %736 = vmatprep.subr.bf16.mxu0 %v735_v30  ;;  %v711_v41 = vpack.c.bf16 %v154_v36, %v147_v35 }
  0x33   :  { %v715_v42 = vpack.c.bf16 %v168_v38, %v161_v37 }
  0x34   :  { %645 = vmatprep.mubr.f32.mxu1 %v126_v39  ;;  %679 = vmatmul.mubr.f32.vlgmr.msra.gmra.mrb[0].mxu0 %v134_v27 }
  0x35   :  { %646 = vmatmul.mubr.f32.vlgmr.msra.gmra.mrb[0].mxu1 %v136_v40  ;;  %712 = vmatprep.subr.bf16.mxu1 %v711_v41 }
  0x36   :  { %714 = vmatpush3.bf16.msra.mxu1 %v711_v41  ;;  %738 = vmatpush3.bf16.msra.mxu0 %v735_v30 }
  0x37   :  { %716 = vmatprep.subr.bf16.mxu1 %v715_v42  ;;  %740 = vmatprep.subr.bf16.mxu0 %v739_v43 }
  0x38   :  { %656 = vmatprep.mubr.f32.mxu1 %v890_v13  ;;  %689 = vmatprep.mubr.f32.mxu0 %v890_v13 }
  0x3a   :  { %718 = vmatpush3.bf16.msra.mxu1 %v715_v42  ;;  %742 = vmatpush3.bf16.msra.mxu0 %v739_v43 }
  0x3b   :  { %720 = vmatprep.subr.bf16.mxu1 %v719_v44  ;;  %744 = vmatprep.subr.bf16.mxu0 %v703_v12 }
  0x3d   :  { %657 = vmatmul.mubr.f32.vlgmr.msra.gmra.mrb[0].mxu1 %v892_v14  ;;  %690 = vmatmul.mubr.f32.vlgmr.msra.gmra.mrb[0].mxu0 %v892_v14 }
  0x3e   :  { %722 = vmatpush3.bf16.msra.mxu1 %v719_v44  ;;  %746 = vmatpush3.bf16.msra.mxu0 %v703_v12 }
  0x3f   :  { %724 = vmatprep.subr.bf16.mxu1 %v723_v45  ;;  %748 = vmatprep.subr.bf16.mxu0 %v707_v16 }
  0x40   :  { %667 = vmatprep.mubr.f32.mxu1 %v123_v20  ;;  %700 = vmatprep.mubr.f32.mxu0 %v890_v13 }
  0x42   :  { %726 = vmatpush3.bf16.msra.mxu1 %v723_v45  ;;  %750 = vmatpush3.bf16.msra.mxu0 %v707_v16 }
  0x45   :  { %668 = vmatmul.mubr.f32.vlgmr.msra.gmra.mrb[0].mxu1 %v133_v21  ;;  %701 = vmatmul.mubr.f32.vlgmr.msra.gmra.mrb[0].mxu0 %v892_v14 }
 0x118   :  { %v669_v46 = vpop.f32.mrb[0].mxu1  ;;  %v702_v47 = vpop.f32.mrb[0].mxu0 }
 0x119   :  { %v751_v48 = vadd.f32 %v702_v47, %v669_v46  ;;  %v315_v49 = vpop.f32.mrb[1].mxu1  ;;  %v571_v50 = vpop.f32.mrb[1].mxu0 }
 0x11a   :  { %v752_v51 = vadd.f32 %v571_v50, %v315_v49 }
 0x11b   :  { %582 = vst.msk [vmem:[#allocation7 + $0x8] sm:$0xff] %vm46_vm0, %v751_v48 }
 0x11c   :  { %581 = vst.msk [vmem:[#allocation7] sm:$0xff] %vm46_vm0, %v752_v51 }
 0x11d   :  { %821 = shalt.err (!%p818_p6)
}
 0x11e   :  { %s822_s10 = scalar_lea.hbm %s921_s2, 256 }
 0x11f   :  { %p823_p7 = scmp.ne.s32.totalorder %s921_s2, %s822_s10  ;;  %p826_p8 = scmp.lt.u32.totalorder %s822_s10, %s921_s2 }
 0x121   :  { %p828_p9 = pnand %p826_p8, %p823_p7 }
 0x123   :  { %831 = shalt.err (!%p828_p9)
}
 0x124   :  { %594 = dma.vmem_to_hbm [thread:$0]  %s589_s6, 256, %s921_s2, [#allocation4], %s839_s19, %s839_s19, %s840_s20  }
 0x125   :  { %836 = dma.done.wait [#allocation4], 256  }
 0x126   :  { %837 = vsyncadd [#allocation4], 4294967040 }
 0x127   :  { %598 = vsyncpa [#allocation3], 1 }
 0x128   :  { %599 = vsyncpa [#allocation6], 1 }
 0x129   :  { %600 = vsyncpa [#allocation4], 1 }

</bundles_post_ra>
